<compile_context>
chip_gen: v6e
topology: v6e:2x2x1
jax: 0.10.0
libtpu: 0.0.40
codegen_flags: <defaults>
</compile_context>

<pallas_src>
import jax
import jax.numpy as jnp
from jax.experimental import pallas as pl
from jax.experimental.pallas import tpu as pltpu

LANES = 128
SLAB = 2 * LANES                 # re | im packed along the lane axis
MAX_BLOCK_ROWS = 2048            # (2048, 256) f32 = 2 MiB per slab block
MIN_BLOCK_ROWS = 256             # below this, a single full-array block


def _cv_sigmoid_kernel(z_ref, out_ref):
    x = z_ref[:, :LANES]                  # Re(z)
    y = z_ref[:, LANES:]                  # Im(z)
    s = jnp.exp(-jnp.abs(x))              # exp(-|x|) in (0, 1]: never overflows
    c = jnp.cos(y)
    sn = jnp.sin(y)
    sc = s * c
    ss = s * s
    denom = 1.0 + 2.0 * sc + ss           # |1 + exp(z)|^2 * exp(-2*max(x, 0))
    inv = pl.reciprocal(denom)            # exact reciprocal (1e-5 tolerance, poles)
    re_num = sc + jnp.where(x > 0.0, ss, 1.0)
    im_num = -(s * sn)
    out_ref[:, :LANES] = re_num * inv
    out_ref[:, LANES:] = im_num * inv


def _round_up(x: int, m: int) -> int:
    return (x + m - 1) // m * m


def _cdiv(a: int, b: int) -> int:
    return (a + b - 1) // b


def _choose_block(rows: int):
    """Pick (block_rows, grid_steps) for a (rows, 256) slab."""
    if rows <= MIN_BLOCK_ROWS:
        # Single block equal to the full array dims (so the (8,128) block
        # divisibility constraint does not apply).
        return rows, 1
    # Aim for an even number of >= 2 steps (v7x megacore load balance) while
    # keeping the block near the ~1-2 MiB HBM-roofline sweet spot (v5e/v6e).
    steps = max(2, _cdiv(rows, MAX_BLOCK_ROWS))
    if steps % 2:
        steps += 1
    block_rows = min(MAX_BLOCK_ROWS, _round_up(_cdiv(rows, steps), 8))
    return block_rows, _cdiv(rows, block_rows)


def _cv_sigmoid_impl(z: jax.Array) -> jax.Array:
    assert jnp.issubdtype(z.dtype, jnp.complexfloating)
    orig_shape = z.shape
    z = z.astype(jnp.complex64)
    n = int(z.size)

    rows = max(_cdiv(n, LANES), 1)
    block_rows, grid_steps = _choose_block(rows)

    # Split + pack into one lane-dense (rows, 256) slab (fused under jit).
    zf = z.reshape(-1)
    x_re = jnp.real(zf).astype(jnp.float32)
    x_im = jnp.imag(zf).astype(jnp.float32)
    padded = rows * LANES
    if padded != n:                       # pad only to a lane multiple (<=127 elems)
        x_re = jnp.pad(x_re, (0, padded - n))
        x_im = jnp.pad(x_im, (0, padded - n))
    packed = jnp.concatenate(
        [x_re.reshape(rows, LANES), x_im.reshape(rows, LANES)], axis=-1)

    blk = pl.BlockSpec((block_rows, SLAB), lambda i: (i, 0))

    out = pl.pallas_call(
        _cv_sigmoid_kernel,
        out_shape=jax.ShapeDtypeStruct((rows, SLAB), jnp.float32),
        grid_spec=pltpu.PrefetchScalarGridSpec(
            num_scalar_prefetch=0,
            grid=(grid_steps,),
            in_specs=[blk],
            out_specs=blk,
        ),
        compiler_params=pltpu.CompilerParams(
            dimension_semantics=("parallel",),
        ),
        cost_estimate=pl.CostEstimate(
            flops=14 * rows * LANES,
            transcendentals=3 * rows * LANES,
            bytes_accessed=16 * rows * LANES,
        ),
    )(packed)

    out_re = out[:, :LANES].reshape(-1)[:n]
    out_im = out[:, LANES:].reshape(-1)[:n]
    return jax.lax.complex(out_re, out_im).reshape(orig_shape)


# One jit over the whole thing: split/pad/pack fuse into a single producer
# pass, slice/recombine/reshape into a single consumer pass.
cv_sigmoid = jax.jit(_cv_sigmoid_impl)


if __name__ == "__main__":
    key = jax.random.PRNGKey(0)
    k_re, k_im, k2_re, k2_im, k3_re, k3_im = jax.random.split(key, 6)

    # Main check: NCHW complex input (batch=2, channels=4, spatial=16x16).
    B, C, H, W = 2, 4, 16, 16
    z = (jax.random.normal(k_re, (B, C, H, W), dtype=jnp.float32)
         + 1j * jax.random.normal(k_im, (B, C, H, W), dtype=jnp.float32)
         ).astype(jnp.complex64)
    out = cv_sigmoid(z)
    jax.block_until_ready(out)
    ref = 1.0 / (1.0 + jnp.exp(z))
    assert out.shape == ref.shape and out.dtype == ref.dtype
    assert jnp.allclose(out, ref, atol=1e-5, rtol=1e-5)

    # Ragged shape (exercises lane padding: 105 elements, single tiny block).
    z2 = (jax.random.normal(k2_re, (3, 5, 7), dtype=jnp.float32)
          + 1j * jax.random.normal(k2_im, (3, 5, 7), dtype=jnp.float32)
          ).astype(jnp.complex64)
    out2 = cv_sigmoid(z2)
    jax.block_until_ready(out2)
    ref2 = 1.0 / (1.0 + jnp.exp(z2))
    assert jnp.allclose(out2, ref2, atol=1e-5, rtol=1e-5)

    # Mid-size ragged shape: exercises the multi-step (even) grid and the
    # masked partial final block (rows=271, block_rows=136, grid=2).
    z3 = (jax.random.normal(k3_re, (2, 4, 33, 131), dtype=jnp.float32)
          + 1j * jax.random.normal(k3_im, (2, 4, 33, 131), dtype=jnp.float32)
          ).astype(jnp.complex64)
    out3 = cv_sigmoid(z3)
    jax.block_until_ready(out3)
    ref3 = 1.0 / (1.0 + jnp.exp(z3))
    assert jnp.allclose(out3, ref3, atol=1e-5, rtol=1e-5)

    # Overflow path: naive 1/(1+exp(z)) would hit inf/NaN; stable form gives limits.
    z4 = jnp.array([200.0 + 1.0j, -200.0 + 0.5j, 88.0 + 3.0j], dtype=jnp.complex64)
    out4 = cv_sigmoid(z4)
    jax.block_until_ready(out4)
    assert jnp.all(jnp.isfinite(out4.real)) and jnp.all(jnp.isfinite(out4.imag))
    assert jnp.allclose(out4[0], 0.0 + 0.0j, atol=1e-6)
    assert jnp.allclose(out4[1], 1.0 + 0.0j, atol=1e-5)

    print("KERNEL_OK")
</pallas_src>

<mosaic_0001>
module attributes {stable_mosaic.version = 11 : i64} {
  func.func @_cv_sigmoid_kernel(%arg0: i32, %arg1: memref<16x256xf32, #tpu.memory_space<vmem>>, %arg2: memref<16x256xf32, #tpu.memory_space<vmem>>) attributes {dimension_semantics = [#tpu.dimension_semantics<parallel>], iteration_bounds = array<i64: 1>, scalar_prefetch = 0 : i64, scratch_operands = 0 : i64, tpu.core_type = #tpu.core_type<tc>, window_params = [{transform_indices = @transform_0, window_bounds = array<i64: 16, 256>}, {transform_indices = @transform_1, window_bounds = array<i64: 16, 256>}]} {
    %c0 = arith.constant 0 : index
    %c0_0 = arith.constant 0 : index
    %0 = vector.load %arg1[%c0, %c0_0] : memref<16x256xf32, #tpu.memory_space<vmem>>, vector<16x128xf32>
    %c0_1 = arith.constant 0 : index
    %c128 = arith.constant 128 : index
    %1 = vector.load %arg1[%c0_1, %c128] : memref<16x256xf32, #tpu.memory_space<vmem>>, vector<16x128xf32>
    %2 = math.absf %0 : vector<16x128xf32>
    %cst = arith.constant 0.000000e+00 : f32
    %3 = vector.broadcast %cst : f32 to vector<16x128xf32>
    %4 = arith.subf %3, %2 : vector<16x128xf32>
    %5 = math.exp %4 : vector<16x128xf32>
    %6 = math.cos %1 : vector<16x128xf32>
    %7 = math.sin %1 : vector<16x128xf32>
    %8 = arith.mulf %5, %6 : vector<16x128xf32>
    %9 = arith.mulf %5, %5 : vector<16x128xf32>
    %cst_2 = arith.constant 2.000000e+00 : f32
    %10 = vector.broadcast %cst_2 : f32 to vector<16x128xf32>
    %11 = arith.mulf %10, %8 : vector<16x128xf32>
    %cst_3 = arith.constant 1.000000e+00 : f32
    %12 = vector.broadcast %cst_3 : f32 to vector<16x128xf32>
    %13 = arith.addf %12, %11 : vector<16x128xf32>
    %14 = arith.addf %13, %9 : vector<16x128xf32>
    %15 = tpu.reciprocal %14 : vector<16x128xf32> -> vector<16x128xf32>
    %cst_4 = arith.constant 0.000000e+00 : f32
    %16 = vector.broadcast %cst_4 : f32 to vector<16x128xf32>
    %17 = arith.cmpf ogt, %0, %16 : vector<16x128xf32>
    %cst_5 = arith.constant 1.000000e+00 : f32
    %18 = vector.broadcast %cst_5 : f32 to vector<16x128xf32>
    %19 = arith.select %17, %9, %18 : vector<16x128xi1>, vector<16x128xf32>
    %20 = arith.addf %8, %19 : vector<16x128xf32>
    %21 = arith.mulf %5, %7 : vector<16x128xf32>
    %cst_6 = arith.constant 0.000000e+00 : f32
    %22 = vector.broadcast %cst_6 : f32 to vector<16x128xf32>
    %23 = arith.subf %22, %21 : vector<16x128xf32>
    %24 = arith.mulf %20, %15 : vector<16x128xf32>
    %c0_7 = arith.constant 0 : index
    %c0_8 = arith.constant 0 : index
    %25 = vector.load %arg2[%c0_7, %c0_8] : memref<16x256xf32, #tpu.memory_space<vmem>>, vector<16x128xf32>
    tpu.vector_store %arg2[%c0_7, %c0_8], %24 {strides = array<i32>} : memref<16x256xf32, #tpu.memory_space<vmem>>, vector<16x128xf32>,
    %26 = arith.mulf %23, %15 : vector<16x128xf32>
    %c0_9 = arith.constant 0 : index
    %c128_10 = arith.constant 128 : index
    %27 = vector.load %arg2[%c0_9, %c128_10] : memref<16x256xf32, #tpu.memory_space<vmem>>, vector<16x128xf32>
    tpu.vector_store %arg2[%c0_9, %c128_10], %26 {strides = array<i32>} : memref<16x256xf32, #tpu.memory_space<vmem>>, vector<16x128xf32>,
    return
  }
  func.func @transform_0(%arg0: i32) -> (i32, i32) {
    %c0_i32 = arith.constant 0 : i32
    %c0_i32_0 = arith.constant 0 : i32
    return %arg0, %c0_i32 : i32, i32
  }
  func.func @transform_1(%arg0: i32) -> (i32, i32) {
    %c0_i32 = arith.constant 0 : i32
    %c0_i32_0 = arith.constant 0 : i32
    return %arg0, %c0_i32 : i32, i32
  }
}

</mosaic_0001>

<bundles_post_ra>
// kernel: custom-call
= control target key start
LH: loop header
LB: loop body
LE: loop exit
PB: predicated region body
PF: predicated region fallthrough
CT: control target
= control target key end

     0   :  { %2 = vsyncpa [#allocation0], 0  ;;  %s47_s0 = inlined_call_operand.hbm [shape: c64[2,4,16,16], index: 0, kind: input, shape index: {}]   ;;  %s48_s1 = inlined_call_operand.vmem [shape: f32[2,4,16,16], index: 1, kind: output, shape index: {}]  }
   0x1   :  { %s3_s8 = sshll.u32 %s48_s1, 4  ;;  %s4_s8 = int_to_ptr.vmem [resolvable:$true] %s3_s8 }
   0x2   :  { %s17_s9 = scalar_lea.vmem %s4_s8, 2048  ;;  %p22_p1 = scmp.lt.s32.totalorder %s4_s8, %s4_s8 }
   0x3   :  { %p18_p0 = scmp.ne.s32.totalorder %s4_s8, %s17_s9  ;;  %p23_p2 = scmp.lt.s32.totalorder %s17_s9, %s17_s9 }
   0x5   :  { %p24_p3 = por %p23_p2, %p22_p1 }
   0x7   :  { %p25_p4 = pnand %p24_p3, %p18_p0 }
   0x9   :  { %28 = shalt.err (!%p25_p4)  }
   0xa   :  { %6 = dma.hbm_to_vmem [thread:$0]  %s47_s0, 2048, %s4_s8, [#allocation0] }
   0xb   :  { %29 = dma.done.wait [#allocation0], 2048  }
   0xc   :  { %30 = vsyncadd [#allocation0], 4294965248 }
   0xd   :  { %8 = vsyncpa [#allocation0], 1 }

// kernel: custom-call.1
= control target key start
LH: loop header
LB: loop body
LE: loop exit
PB: predicated region body
PF: predicated region fallthrough
CT: control target
= control target key end

     0   :  { %s51_s0 = inlined_call_operand.hbm [shape: c64[2,4,16,16], index: 0, kind: input, shape index: {}]   ;;  %s52_s1 = inlined_call_operand.vmem [shape: f32[2,4,16,16], index: 1, kind: output, shape index: {}]  }
   0x1   :  { %s2_s8 = scalar_lea.hbm %s51_s0, 2048 }
   0x2   :  { %3 = vsyncpa [#allocation0], 0  ;;  %s4_s11 = sshll.u32 %s52_s1, 4  ;;  %s5_s11 = int_to_ptr.vmem [resolvable:$true] %s4_s11 }
   0x3   :  { %s20_s12 = scalar_lea.vmem %s5_s11, 2048  ;;  %p25_p1 = scmp.lt.s32.totalorder %s5_s11, %s5_s11 }
   0x4   :  { %p21_p0 = scmp.ne.s32.totalorder %s5_s11, %s20_s12  ;;  %p26_p2 = scmp.lt.s32.totalorder %s20_s12, %s20_s12 }
   0x6   :  { %p27_p3 = por %p26_p2, %p25_p1 }
   0x8   :  { %p28_p4 = pnand %p27_p3, %p21_p0 }
   0xa   :  { %31 = shalt.err (!%p28_p4)  }
   0xb   :  { %7 = dma.hbm_to_vmem [thread:$0]  %s2_s8, 2048, %s5_s11, [#allocation0] }
   0xc   :  { %33 = dma.done.wait [#allocation0], 2048  }
   0xd   :  { %34 = vsyncadd [#allocation0], 4294965248 }
   0xe   :  { %9 = vsyncpa [#allocation0], 1 }

// kernel: custom-call.2
= control target key start
LH: loop header
LB: loop body
LE: loop exit
PB: predicated region body
PF: predicated region fallthrough
CT: control target
= control target key end

     0   :  { %s92_s0 = inlined_call_operand.vmem [shape: f32[2,4,16,16], index: 0, kind: input, shape index: {}]   ;;  %s93_s1 = inlined_call_operand.vmem [shape: f32[2,4,16,16], index: 1, kind: input, shape index: {}]   ;;  %s94_s2 = inlined_call_operand.hbm [shape: c64[2,4,16,16], index: 2, kind: output, shape index: {}]  }
   0x1   :  { %s3_s11 = scalar_lea.hbm %s94_s2, 2048 }
   0x2   :  { %4 = vsyncpa [#allocation0], 0  ;;  %s5_s14 = sshll.u32 %s92_s0, 4  ;;  %s6_s14 = int_to_ptr.vmem [resolvable:$true] %s5_s14 }
   0x3   :  { %s18_s15 = scalar_lea.vmem %s6_s14, 2048  ;;  %p23_p1 = scmp.lt.s32.totalorder %s6_s14, %s6_s14 }
   0x4   :  { %p19_p0 = scmp.ne.s32.totalorder %s6_s14, %s18_s15  ;;  %p24_p2 = scmp.lt.s32.totalorder %s18_s15, %s18_s15 }
   0x6   :  { %p25_p3 = por %p24_p2, %p23_p1 }
   0x8   :  { %p26_p4 = pnand %p25_p3, %p19_p0 }
   0xa   :  { %29 = shalt.err (!%p26_p4)  }
   0xb   :  { %8 = dma.vmem_to_hbm [thread:$0]  %s6_s14, 2048, %s94_s2, [#allocation0] }
   0xc   :  { %61 = dma.done.wait [#allocation0], 2048  }
   0xd   :  { %62 = vsyncadd [#allocation0], 4294965248 }
   0xe   :  { %10 = vsyncpa [#allocation0], 1 }
   0xf   :  { %11 = vsyncpa [#allocation1], 0  ;;  %s12_s0 = sshll.u32 %s93_s1, 4  ;;  %s13_s0 = int_to_ptr.vmem [resolvable:$true] %s12_s0 }
  0x10   :  { %s38_s20 = scalar_lea.vmem %s13_s0, 2048  ;;  %p43_p6 = scmp.lt.s32.totalorder %s13_s0, %s13_s0 }
  0x11   :  { %p39_p5 = scmp.ne.s32.totalorder %s13_s0, %s38_s20  ;;  %p44_p7 = scmp.lt.s32.totalorder %s38_s20, %s38_s20 }
  0x13   :  { %p45_p8 = por %p44_p7, %p43_p6 }
  0x15   :  { %p46_p9 = pnand %p45_p8, %p39_p5 }
  0x17   :  { %49 = shalt.err (!%p46_p9)  }
  0x18   :  { %15 = dma.vmem_to_hbm [thread:$0]  %s13_s0, 2048, %s3_s11, [#allocation1] }
  0x19   :  { %63 = dma.done.wait [#allocation1], 2048  }
  0x1a   :  { %64 = vsyncadd [#allocation1], 4294965248 }
  0x1b   :  { %17 = vsyncpa [#allocation1], 1 }

// kernel: _cv_sigmoid_impl.1
= control target key start
LH: loop header
LB: loop body
LE: loop exit
PB: predicated region body
PF: predicated region fallthrough
CT: control target
= control target key end

     0   :  { %v514_v21 = vmov 683565275   ;;  %v515_v23 = vmov 2475754826   ;;  %v516_v25 = vmov 2131351028   ;;  %s671_s0 = inlined_call_operand.vmem [shape: f32[16,256], index: 0, kind: input, shape index: {}]   ;;  %s672_s1 = inlined_call_operand.vmem [shape: f32[16,256], index: 1, kind: output, shape index: {}]  }
   0x1   :  { %v533_v0 = vld [vmem:[%s671_s0 + $0x8] sm:$0xff]  ;;  %v538_v1 = vld [vmem:[%s671_s0 + $0x18] sm:$0xff]  ;;  %v517_v27 = vmov 2102212464   ;;  %v518_v29 = vmov 920167782  }
   0x2   :  { %v20_v2 = vand.u32 2147483647, %v533_v0  ;;  %v23_v3 = vand.u32 2139095040, %v533_v0  ;;  %v126_v5 = vand.u32 2139095040, %v538_v1  ;;  %v123_v7 = vand.u32 2147483647, %v538_v1 }
   0x3   :  { %v519_v37 = vmov 1326507024   ;;  %vm22_vm14 = vcmp.lt.s32.totalorder %v533_v0, 0 }
   0x4   :  { %v24_v4 = vshrl.u32 %v23_v3, 23  ;;  %v27_v6 = vand.u32 8388607, %v20_v2  ;;  %v127_v9 = vshrl.u32 %v126_v5, 23  ;;  %v548_v13 = vand.u32 8388607, %v123_v7 }
   0x5   :  { %vm608_vm15 = vcmp.le.f32.partialorder %v20_v2, 0.7853982  ;;  %v621_v2 = vld [vmem:[%s671_s0 + $0x10] sm:$0xff] }
   0x6   :  { %v468_v8 = vadd.s32 4294967169, %v24_v4  ;;  %v472_v11 = vadd.s32 4294967169, %v127_v9  ;;  %v28_v12 = vor.u32 8388608, %v27_v6  ;;  %v131_v19 = vor.u32 8388608, %v548_v13 }
   0x8   :  { %v30_v10 = vadd.s32 1, %v468_v8  ;;  %v133_v14 = vadd.s32 1, %v472_v11  ;;  %v550_v18 = vshll.u32 %v28_v12, 8 }
   0xa   :  { %vm31_vm0 = vcmp.gt.s32.totalorder %v30_v10, 0  ;;  %vm134_vm1 = vcmp.gt.s32.totalorder %v133_v14, 0 }
   0xb   :  { %v32_v15 = vsel %vm31_vm0, %v30_v10, 0  ;;  %v135_v31 = vsel %vm134_vm1, %v133_v14, 0  ;;  %vm125_vm0 = vcmp.lt.s32.totalorder %v538_v1, 0  ;;  %vm632_vm1 = vcmp.le.f32.partialorder %v123_v7, 0.7853982 }
   0xc   :  { %v33_v16 = vshrl.u32 %v32_v15, 5  ;;  %v34_v17 = vand.u32 31, %v32_v15  ;;  %v136_v44 = vshrl.u32 %v135_v31, 5  ;;  %v137_v45 = vand.u32 31, %v135_v31 }
   0xe   :  { %v35_v20 = vsub.s32 32, %v34_v17  ;;  %v37_v22 = vshll.u32 %v514_v21, %v34_v17  ;;  %v40_v24 = vshll.u32 %v515_v23, %v34_v17  ;;  %v43_v26 = vshll.u32 %v516_v25, %v34_v17 }
   0xf   :  { %v46_v28 = vshll.u32 %v517_v27, %v34_v17  ;;  %v49_v30 = vshll.u32 %v518_v29, %v34_v17  ;;  %vm52_vm2 = vcmp.lt.s32.totalorder %v33_v16, 1  ;;  %vm53_vm3 = vcmp.lt.s32.totalorder %v33_v16, 2 }
  0x10   :  { %v36_v32 = vshrl.u32 %v514_v21, %v35_v20  ;;  %v38_v33 = vshrl.u32 %v515_v23, %v35_v20  ;;  %v41_v34 = vshrl.u32 %v516_v25, %v35_v20  ;;  %v44_v35 = vshrl.u32 %v517_v27, %v35_v20 }
  0x11   :  { %v47_v36 = vshrl.u32 %v518_v29, %v35_v20  ;;  %v50_v38 = vshrl.u32 %v519_v37, %v35_v20  ;;  %vm54_vm4 = vcmp.lt.s32.totalorder %v33_v16, 3  ;;  %vm55_vm5 = vcmp.lt.s32.totalorder %v33_v16, 4 }
  0x12   :  { %v39_v39 = vor.u32 %v38_v33, %v37_v22  ;;  %v42_v40 = vor.u32 %v41_v34, %v40_v24  ;;  %v45_v41 = vor.u32 %v44_v35, %v43_v26  ;;  %v138_v53 = vsub.s32 32, %v137_v45 }
  0x13   :  { %v48_v42 = vor.u32 %v47_v36, %v46_v28  ;;  %v51_v43 = vor.u32 %v50_v38, %v49_v30  ;;  %v140_v57 = vshll.u32 %v514_v21, %v137_v45  ;;  %v143_v6 = vshll.u32 %v515_v23, %v137_v45 }
  0x14   :  { %v56_v46 = vsel %vm52_vm2, %v36_v32, %v39_v39  ;;  %v57_v47 = vsel %vm55_vm5, %v45_v41, 2102212464  ;;  %v60_v48 = vsel %vm52_vm2, %v39_v39, %v42_v40  ;;  %v64_v49 = vsel %vm52_vm2, %v42_v40, %v45_v41 }
  0x15   :  { %v58_v50 = vsel %vm54_vm4, %v42_v40, %v57_v47  ;;  %v61_v51 = vsel %vm55_vm5, %v48_v42, 920167782  ;;  %v65_v52 = vsel %vm55_vm5, %v51_v43, 1326507024  ;;  %v139_v61 = vshrl.u32 %v514_v21, %v138_v53 }
  0x16   :  { %v59_v54 = vsel %vm53_vm3, %v56_v46, %v58_v50  ;;  %v62_v55 = vsel %vm54_vm4, %v45_v41, %v61_v51  ;;  %v66_v56 = vsel %vm54_vm4, %v48_v42, %v65_v52  ;;  %v141_v5 = vshrl.u32 %v515_v23, %v138_v53 }
  0x17   :  { %v63_v58 = vsel %vm53_vm3, %v60_v48, %v62_v55  ;;  %v67_v59 = vsel %vm53_vm3, %v64_v49, %v66_v56  ;;  %v75_v60 = vmul.u32 %v550_v18, %v59_v54  ;;  %v144_v8 = vshrl.u32 %v516_v25, %v138_v53 }
  0x18   :  { %v564_v62 = vmul.u32.u64.low %v550_v18, %v67_v59  ;;  %v565_v63 = vmul.u32.u64.high %v550_v18, %v67_v59, %v564_v62  ;;  %v568_v3 = vmul.u32.u64.low %v550_v18, %v63_v58  ;;  %v569_v4 = vmul.u32.u64.high %v550_v18, %v63_v58, %v568_v3 }
  0x19   :  { %v146_v9 = vshll.u32 %v516_v25, %v137_v45  ;;  %v147_v10 = vshrl.u32 %v517_v27, %v138_v53  ;;  %v149_v11 = vshll.u32 %v517_v27, %v137_v45  ;;  %v150_v12 = vshrl.u32 %v518_v29, %v138_v53 }
  0x1a   :  { %v152_v14 = vshll.u32 %v518_v29, %v137_v45  ;;  %v142_v15 = vor.u32 %v141_v5, %v140_v57  ;;  %v145_v16 = vor.u32 %v144_v8, %v143_v6  ;;  %v153_v17 = vshrl.u32 %v519_v37, %v138_v53 }
  0x1b   :  { %vm155_vm6 = vcmp.lt.s32.totalorder %v136_v44, 1  ;;  %vm77_vm7 = vc.u32 %v565_v63, %v568_v3  ;;  %v78_v20 = vadd.s32 1, %v569_v4  ;;  %v148_v21 = vor.u32 %v147_v10, %v146_v9  ;;  %v601_v9 = vld [vmem:[%s671_s0] sm:$0xff] }
  0x1c   :  { %v171_v18 = vshll.u32 %v131_v19, 8  ;;  %v151_v22 = vor.u32 %v150_v12, %v149_v11  ;;  %v154_v23 = vor.u32 %v153_v17, %v152_v14  ;;  %vm156_vm8 = vcmp.lt.s32.totalorder %v136_v44, 2 }
  0x1d   :  { %vm157_vm9 = vcmp.lt.s32.totalorder %v136_v44, 3  ;;  %v79_v24 = vsel %vm77_vm7, %v78_v20, %v569_v4  ;;  %vm158_vm10 = vcmp.lt.s32.totalorder %v136_v44, 4  ;;  %v159_v25 = vsel %vm155_vm6, %v139_v61, %v142_v15 }
  0x1e   :  { %v163_v26 = vsel %vm155_vm6, %v142_v15, %v145_v16  ;;  %v80_v27 = vadd.s32 %v79_v24, %v75_v60  ;;  %v160_v28 = vsel %vm158_vm10, %v148_v21, 2102212464  ;;  %v164_v29 = vsel %vm158_vm10, %v151_v22, 920167782 }
  0x1f   :  { %v167_v30 = vsel %vm155_vm6, %v145_v16, %v148_v21  ;;  %v161_v31 = vsel %vm157_vm9, %v145_v16, %v160_v28  ;;  %v165_v32 = vsel %vm157_vm9, %v148_v21, %v164_v29  ;;  %v168_v13 = vsel %vm158_vm10, %v154_v23, 1326507024 }
  0x20   :  { %v81_v19 = vadd.s32 536870912, %v80_v27  ;;  %v166_v33 = vsel %vm156_vm8, %v163_v26, %v165_v32  ;;  %v169_v34 = vsel %vm157_vm9, %v151_v22, %v168_v13  ;;  %v162_v35 = vsel %vm156_vm8, %v159_v25, %v161_v31 }
  0x21   :  { %v170_v36 = vsel %vm156_vm8, %v167_v30, %v169_v34  ;;  %v582_v37 = vmul.u32.u64.low %v171_v18, %v166_v33  ;;  %v583_v38 = vmul.u32.u64.high %v171_v18, %v166_v33, %v582_v37  ;;  %v178_v43 = vmul.u32 %v171_v18, %v162_v35 }
  0x22   :  { %v585_v39 = vshrl.u32 %v81_v19, 30  ;;  %v587_v40 = vmul.u32.u64.low %v171_v18, %v170_v36  ;;  %v588_v41 = vmul.u32.u64.high %v171_v18, %v170_v36, %v587_v40  ;;  %v76_v55 = vadd.s32 %v568_v3, %v565_v63 }
  0x23   :  { %v181_v45 = vadd.s32 1, %v583_v38  ;;  %v12_v12 = vand.u32 2147483647, %v601_v9  ;;  %v13_v33 = vand.u32 2147483647, %v621_v2  ;;  %vm112_vm5 = vweird.f32 %v533_v0 }
  0x24   :  { %v83_v42 = vshll.u32 %v585_v39, 30  ;;  %vm180_vm11 = vc.u32 %v588_v41, %v582_v37  ;;  %v179_v15 = vadd.s32 %v582_v37, %v588_v41  ;;  %v106_v28 = vsub.s32 4, %v585_v39 }
  0x25   :  { %v182_v47 = vsel %vm180_vm11, %v181_v45, %v583_v38  ;;  %v14_v22 = vsub.f32 0.0, %v12_v12  ;;  %v15_v38 = vsub.f32 0.0, %v13_v33 }
  0x26   :  { %v84_v46 = vsub.s32 %v80_v27, %v83_v42  ;;  %v183_v48 = vadd.s32 %v182_v47, %v178_v43  ;;  %v107_v34 = vsel %vm22_vm14, %v106_v28, %v585_v39 }
  0x27   :  { %v16_v32 = vmul.f32 1.442695, %v14_v22  ;;  %v109_v37 = vsel %vm608_vm15, 0, %v107_v34 }
  0x28   :  { %v86_v44 = vsub.s32 0, %v84_v46  ;;  %v184_v50 = vadd.s32 536870912, %v183_v48  ;;  %v113_v42 = vand.u32 3, %v109_v37 }
  0x2a   :  { %v469_v49 = vmin.u32 %v86_v44, %v84_v46  ;;  %v594_v52 = vshrl.u32 %v184_v50, 30  ;;  %vm118_vm2 = vcmp.eq.s32.totalorder %v113_v42, 2  ;;  %vm115_vm3 = vcmp.eq.s32.totalorder %v113_v42, 0 }
  0x2b   :  { %vm114_vm4 = vcmp.lt.s32.totalorder %v113_v42, 2 }
  0x2c   :  { %v88_v51 = vclz %v469_v49  ;;  %v186_v54 = vshll.u32 %v594_v52, 30  ;;  %v209_v43 = vsub.s32 4, %v594_v52  ;;  %v319_v49 = vadd.s32 3, %v109_v37 }
  0x2e   :  { %v470_v53 = vadd.s32 4294967294, %v88_v51  ;;  %v187_v57 = vsub.s32 %v183_v48, %v186_v54  ;;  %v210_v48 = vsel %vm125_vm0, %v209_v43, %v594_v52 }
  0x30   :  { %vm471_vm12 = vcmp.lt.s32.totalorder %v470_v53, 0  ;;  %v189_v61 = vsub.s32 0, %v187_v57 }
  0x31   :  { %v91_v56 = vsel %vm471_vm12, 0, %v470_v53  ;;  %vm215_vm12 = vweird.f32 %v538_v1 }
  0x32   :  { %v92_v58 = vsub.s32 32, %v91_v56  ;;  %v93_v59 = vshll.u32 %v84_v46, %v91_v56  ;;  %v96_v60 = vsub.s32 4294967266, %v91_v56  ;;  %v473_v5 = vmin.u32 %v189_v61, %v187_v57 }
  0x33   :  { %v18_v46 = vmul.f32 1.442695, %v15_v38 }
  0x34   :  { %v94_v62 = vshrl.u32 %v76_v55, %v92_v58  ;;  %v97_v4 = vadd.s32 127, %v96_v60  ;;  %v191_v10 = vclz %v473_v5  ;;  %v212_v55 = vsel %vm632_vm1, 0, %v210_v48 }
  0x36   :  { %v95_v6 = vor.u32 %v94_v62, %v93_v59  ;;  %v98_v8 = vshll.u32 %v97_v4, 23  ;;  %v474_v3 = vadd.s32 4294967294, %v191_v10  ;;  %v216_v59 = vand.u32 3, %v212_v55 }
  0x37   :  { %v423_v4 = vadd.s32 3, %v212_v55 }
  0x38   :  { %v99_v11 = vor.u32 4788187, %v98_v8  ;;  %v102_v63 = vcvt.s32.f32 %v95_v6  ;;  %vm475_vm13 = vcmp.lt.s32.totalorder %v474_v3, 0  ;;  %vm221_vm8 = vcmp.eq.s32.totalorder %v216_v59, 2 }
  0x39   :  { %v194_v17 = vsel %vm475_vm13, 0, %v474_v3  ;;  %vm218_vm10 = vcmp.eq.s32.totalorder %v216_v59, 0  ;;  %vm217_vm11 = vcmp.lt.s32.totalorder %v216_v59, 2  ;;  %vm446_vm13 = vcmp.gt.f32.partialorder %v601_v9, 0.0 }
  0x3a   :  { %v100_v14 = vand.u32 2147483647, %v99_v11  ;;  %v195_v20 = vsub.s32 32, %v194_v17  ;;  %v196_v21 = vshll.u32 %v187_v57, %v194_v17  ;;  %v199_v18 = vsub.s32 4294967266, %v194_v17 }
  0x3b   :  { %v320_v57 = vand.u32 3, %v319_v49 }
  0x3c   :  { %v103_v16 = vmul.f32 %v102_v63, %v100_v14  ;;  %v197_v25 = vshrl.u32 %v179_v15, %v195_v20  ;;  %v200_v26 = vadd.s32 127, %v199_v18  ;;  %v424_v20 = vand.u32 3, %v423_v4 }
  0x3d   :  { %vm322_vm6 = vcmp.eq.s32.totalorder %v320_v57, 0  ;;  %vm325_vm7 = vcmp.eq.s32.totalorder %v320_v57, 2  ;;  %vm321_vm9 = vcmp.lt.s32.totalorder %v320_v57, 2 }
  0x3e   :  { %v104_v24 = vxor.u32 2147483648, %v103_v16  ;;  %v198_v30 = vor.u32 %v197_v25, %v196_v21  ;;  %v201_v31 = vshll.u32 %v200_v26, 23 }
  0x40   :  { %v105_v27 = vsel %vm22_vm14, %v104_v24, %v103_v16  ;;  %v202_v13 = vor.u32 4788187, %v201_v31  ;;  %v205_v19 = vcvt.s32.f32 %v198_v30  ;;  %vm426_vm14 = vcmp.eq.s32.totalorder %v424_v20, 0 }
  0x41   :  { %v108_v29 = vsel %vm608_vm15, %v533_v0, %v105_v27  ;;  %vm429_vm15 = vcmp.eq.s32.totalorder %v424_v20, 2 }
  0x42   :  { %498 = vcosq.f32 %v108_v29  ;;  %v203_v35 = vand.u32 2147483647, %v202_v13 }
  0x43   :  { %500 = vsinq.f32 %v108_v29 }
  0x44   :  { %502 = vpow2.f32 %v16_v32  ;;  %v206_v36 = vmul.f32 %v205_v19, %v203_v35 }
  0x46   :  { %v207_v41 = vxor.u32 2147483648, %v206_v36 }
  0x48   :  { %v208_v39 = vsel %vm125_vm0, %v207_v41, %v206_v36  ;;  %vm425_vm0 = vcmp.lt.s32.totalorder %v424_v20, 2 }
  0x49   :  { %v211_v45 = vsel %vm632_vm1, %v538_v1, %v208_v39  ;;  %vm447_vm1 = vcmp.gt.f32.partialorder %v621_v2, 0.0 }
  0x4a   :  { %504 = vcosq.f32 %v211_v45 }
  0x4b   :  { %506 = vsinq.f32 %v211_v45 }
  0x4c   :  { %508 = vpow2.f32 %v18_v46 }
  0x4f   :  { %v499_v47 = vpop.eup %498 }
  0x50   :  { %v501_v7 = vpop.eup %500  ;;  %v119_v44 = vxor.u32 2147483648, %v499_v47 }
  0x51   :  { %v116_v50 = vxor.u32 2147483648, %v501_v7  ;;  %v503_v53 = vpop.eup %502 }
  0x52   :  { %v120_v51 = vsel %vm118_vm2, %v119_v44, %v501_v7  ;;  %v436_v52 = vmul.f32 %v503_v53, %v503_v53  ;;  %v327_v11 = vsel %vm325_vm7, %v119_v44, %v501_v7 }
  0x53   :  { %v117_v54 = vsel %vm115_vm3, %v499_v47, %v116_v50  ;;  %v324_v10 = vsel %vm322_vm6, %v499_v47, %v116_v50 }
  0x54   :  { %v121_v56 = vsel %vm114_vm4, %v117_v54, %v120_v51  ;;  %v328_v16 = vsel %vm321_vm9, %v324_v10, %v327_v11  ;;  %v448_v27 = vsel %vm446_vm13, %v436_v52, 1.0 }
  0x55   :  { %v122_v58 = vsel %vm112_vm5, nan, %v121_v56  ;;  %v329_v18 = vsel %vm112_vm5, nan, %v328_v16 }
  0x56   :  { %v434_v60 = vmul.f32 %v503_v53, %v122_v58  ;;  %v452_v25 = vmul.f32 %v503_v53, %v329_v18 }
  0x57   :  { %v505_v62 = vpop.eup %504 }
  0x58   :  { %v438_v61 = vmul.f32 2.0, %v434_v60  ;;  %v507_v6 = vpop.eup %506  ;;  %v222_v8 = vxor.u32 2147483648, %v505_v62  ;;  %v450_v31 = vadd.f32 %v448_v27, %v434_v60  ;;  %v454_v32 = vsub.f32 0.0, %v452_v25 }
  0x59   :  { %v219_v63 = vxor.u32 2147483648, %v507_v6  ;;  %v509_v14 = vpop.eup %508 }
  0x5a   :  { %v440_v5 = vadd.f32 1.0, %v438_v61  ;;  %v223_v12 = vsel %vm221_vm8, %v222_v8, %v507_v6  ;;  %v437_v23 = vmul.f32 %v509_v14, %v509_v14  ;;  %v431_v29 = vsel %vm429_vm15, %v222_v8, %v507_v6 }
  0x5b   :  { %v220_v15 = vsel %vm218_vm10, %v505_v62, %v219_v63  ;;  %v428_v28 = vsel %vm426_vm14, %v505_v62, %v219_v63 }
  0x5c   :  { %v442_v3 = vadd.f32 %v440_v5, %v436_v52  ;;  %v224_v17 = vsel %vm217_vm11, %v220_v15, %v223_v12  ;;  %v432_v13 = vsel %vm425_vm0, %v428_v28, %v431_v29  ;;  %v449_v35 = vsel %vm447_vm1, %v437_v23, 1.0 }
  0x5d   :  { %v225_v21 = vsel %vm215_vm12, nan, %v224_v17  ;;  %v433_v19 = vsel %vm215_vm12, nan, %v432_v13 }
  0x5e   :  { %510 = vrcp.f32 %v442_v3  ;;  %v435_v22 = vmul.f32 %v509_v14, %v225_v21  ;;  %v453_v34 = vmul.f32 %v509_v14, %v433_v19 }
  0x60   :  { %v439_v24 = vmul.f32 2.0, %v435_v22  ;;  %v451_v36 = vadd.f32 %v449_v35, %v435_v22  ;;  %v455_v37 = vsub.f32 0.0, %v453_v34 }
  0x62   :  { %v441_v26 = vadd.f32 1.0, %v439_v24 }
  0x64   :  { %v443_v30 = vadd.f32 %v441_v26, %v437_v23 }
  0x66   :  { %512 = vrcp.f32 %v443_v30 }
  0x6b   :  { %v511_v0 = vpop.eup %510 }
  0x6c   :  { %v456_v9 = vmul.f32 %v511_v0, %v450_v31  ;;  %v460_v33 = vmul.f32 %v511_v0, %v454_v32 }
  0x6e   :  { %458 = vst [vmem:[%s672_s1] sm:$0xff] %v456_v9  ;;  %462 = vst [vmem:[%s672_s1 + $0x8] sm:$0xff] %v460_v33 }
  0x73   :  { %v513_v38 = vpop.eup %512 }
  0x74   :  { %v457_v40 = vmul.f32 %v513_v38, %v451_v36  ;;  %v461_v1 = vmul.f32 %v513_v38, %v455_v37 }
  0x76   :  { %459 = vst [vmem:[%s672_s1 + $0x10] sm:$0xff] %v457_v40  ;;  %463 = vst [vmem:[%s672_s1 + $0x18] sm:$0xff] %v461_v1 }

</bundles_post_ra>
